<compile_context>
chip_gen: v6e
topology: v6e:2x2x1
jax: 0.10.0
libtpu: 0.0.40
codegen_flags: <defaults>
</compile_context>

<pallas_src>
import jax
import jax.numpy as jnp
from jax import lax
from jax.experimental import pallas as pl
from jax.experimental.pallas import tpu as pltpu


def linear_kernel(x_ref, wt_ref, b_ref, h_ref, ht_ref):
    """h_tile = x_tile @ W^T + b ; sentinel on global row 0 ; also write h_tile^T."""
    x = x_ref[...]                         # [TM, Din]
    wt = wt_ref[...]                       # [Din, Dpad]   (W^T, resident)
    b = b_ref[...]                         # [1, Dpad]
    tm = x.shape[0]

    h = jnp.dot(x, wt, preferred_element_type=jnp.float32) + b        # [TM, Dpad]

    # h[0].fill_(-9e15): only global row 0 (tile 0, local row 0).
    grow = lax.broadcasted_iota(jnp.int32, h.shape, 0) + pl.program_id(0) * tm
    h = jnp.where(grow == 0, -9e15, h)

    h_ref[...] = h
    ht_ref[...] = h.T                      # one small [TM, Dpad] transpose per tile


def attn_kernel(ht_ref, hfull_ref, idx_ref, out_ref):
    tm, dpad = out_ref.shape
    i = pl.program_id(0)
    row0 = pl.multiple_of(i * tm, tm)

    h_t = hfull_ref[pl.ds(row0, tm), :]    # [TM, Dpad]  sliced from resident h
    h_T = ht_ref[...]                      # [Dpad, Npad] resident
    idx = idx_ref[...]                     # [TM, K] int32
    npad = h_T.shape[1]
    k_nbr = idx.shape[1]

    # One score matmul per tile: row i of s_all holds h_i . h_j for all j.
    s_all = jnp.dot(h_t, h_T, preferred_element_type=jnp.float32)     # [TM, Npad]

    # Self score on the VPU (diagonal of this tile's score block).
    self_s = jnp.sum(h_t * h_t, axis=-1, keepdims=True)               # [TM, 1]

    # Neighbor scores: masked lane-reduce picks column idx[:, k] of s_all.
    # NOTE: indices are assumed in [0, N); padded columns are never selected.
    col = lax.broadcasted_iota(jnp.int32, (tm, npad), 1)
    s_list = [
        jnp.sum(jnp.where(col == idx[:, k:k + 1], s_all, 0.0),
                axis=-1, keepdims=True)                                # [TM, 1]
        for k in range(k_nbr)
    ]
    # TODO(synk): for large K switch this unrolled loop to lax.fori_loop with a
    # running max/denominator carry to bound live temporaries.

    # Softmax over the (1 + K) positions; only position 0 is needed downstream.
    m = self_s
    for s_k in s_list:
        m = jnp.maximum(m, s_k)
    e_self = jnp.exp(self_s - m)
    denom = e_self
    for s_k in s_list:
        denom = denom + jnp.exp(s_k - m)
    att0 = e_self / denom                                              # [TM, 1]

    out = h_t * att0
    # h[0].fill_(0): only global row 0.
    grow = lax.broadcasted_iota(jnp.int32, out.shape, 0) + i * tm
    out_ref[...] = jnp.where(grow == 0, 0.0, out)


def gat_forward(x, a2a, w, b, *, tm=None):
    """x: [N, Din] f32, a2a: [N, K] int32, w: [Dout, Din], b: [Dout]."""
    x = jnp.asarray(x, jnp.float32)
    a2a = jnp.asarray(a2a, jnp.int32)
    w = jnp.asarray(w, jnp.float32)
    b = jnp.asarray(b, jnp.float32)
    N, din = x.shape
    dout = w.shape[0]
    K = a2a.shape[1]

    LANE = 128
    npad = ((N + LANE - 1) // LANE) * LANE          # nodes padded to sub/lane tile
    dpad = ((dout + LANE - 1) // LANE) * LANE       # lane-dense h / out

    if tm is None:
        tm = 256 if (npad % 256 == 0 and npad >= 256) else 128
    assert npad % tm == 0
    grid = (npad // tm,)

    # Wrapper-side padding / one-time W transpose (constants across the grid).
    x_p = jnp.pad(x, ((0, npad - N), (0, 0)))                       # zero features
    a2a_p = jnp.pad(a2a, ((0, npad - N), (0, 0)))                   # padded rows -> node 0
    wt_p = jnp.pad(w.T, ((0, 0), (0, dpad - dout)))                 # [Din, Dpad]
    b_p = jnp.pad(b.reshape(1, dout), ((0, 0), (0, dpad - dout)))   # [1, Dpad]

    params = pltpu.CompilerParams(dimension_semantics=("parallel",),
                                  vmem_limit_bytes=64 * 1024 * 1024)

    # Pass 1: h = linear(x) with sentinel row 0; also emit h^T for pass 2.
    h, h_t = pl.pallas_call(
        linear_kernel,
        grid=grid,
        in_specs=[
            pl.BlockSpec((tm, din), lambda i: (i, 0)),      # x row tile
            pl.BlockSpec((din, dpad), lambda i: (0, 0)),    # W^T (resident)
            pl.BlockSpec((1, dpad), lambda i: (0, 0)),      # b   (resident)
        ],
        out_specs=(pl.BlockSpec((tm, dpad), lambda i: (i, 0)),
                   pl.BlockSpec((dpad, tm), lambda i: (0, i))),
        out_shape=(jax.ShapeDtypeStruct((npad, dpad), jnp.float32),
                   jax.ShapeDtypeStruct((dpad, npad), jnp.float32)),
        compiler_params=params,
    )(x_p, wt_p, b_p)

    # Pass 2: row-tiled attention; h and h^T resident in VMEM.
    out = pl.pallas_call(
        attn_kernel,
        grid=grid,
        in_specs=[
            pl.BlockSpec((dpad, npad), lambda i: (0, 0)),   # h^T, resident
            pl.BlockSpec((npad, dpad), lambda i: (0, 0)),   # h,   resident (sliced per tile)
            pl.BlockSpec((tm, K), lambda i: (i, 0)),        # a2a row tile
        ],
        out_specs=pl.BlockSpec((tm, dpad), lambda i: (i, 0)),
        out_shape=jax.ShapeDtypeStruct((npad, dpad), jnp.float32),
        compiler_params=params,
    )(h_t, h, a2a_p)

    return out[:N, :dout]


def gat_ref(x, a2a, w, b):
    """Pure-JAX reference mirroring the PyTorch forward exactly."""
    h = x @ w.T + b
    h = h.at[0].set(-9e15)
    neighbors = jnp.concatenate([h[:, None, :], h[a2a]], axis=1)   # [N, 1+K, D]
    att = jnp.einsum("nkd,nd->nk", neighbors, h)                   # bmm
    att = jax.nn.softmax(att, axis=1)
    out = h * att[:, 0:1]
    out = out.at[0].set(0.0)
    return out


if __name__ == "__main__":
    N, DIN, DOUT, K = 32, 16, 32, 4   # small graph: 32 nodes, 4 neighbors each

    key = jax.random.PRNGKey(0)
    kx, ka, kw, kb = jax.random.split(key, 4)

    x = jax.random.normal(kx, (N, DIN), dtype=jnp.float32)
    # neighbor indices in [1, N) (index 0 is the sentinel row in this model)
    a2a = jax.random.randint(ka, (N, K), 1, N, dtype=jnp.int32)

    # Deterministic nn.Linear-style init: U(-1/sqrt(Din), 1/sqrt(Din))
    bound = 1.0 / (DIN ** 0.5)
    w = jax.random.uniform(kw, (DOUT, DIN), jnp.float32, -bound, bound)
    b = jax.random.uniform(kb, (DOUT,), jnp.float32, -bound, bound)

    out = jax.block_until_ready(gat_forward(x, a2a, w, b))
    ref = jax.block_until_ready(gat_ref(x, a2a, w, b))

    assert out.shape == (N, DOUT) and out.dtype == jnp.float32
    assert jnp.allclose(out, ref, rtol=1e-2, atol=1e-3), "mismatch vs reference"
    print("KERNEL_OK")
</pallas_src>

<mosaic_0001>
module attributes {stable_mosaic.version = 11 : i64} {
  func.func @linear_kernel(%arg0: i32, %arg1: memref<128x16xf32, #tpu.memory_space<vmem>>, %arg2: memref<16x128xf32, #tpu.memory_space<vmem>>, %arg3: memref<1x128xf32, #tpu.memory_space<vmem>>, %arg4: memref<128x128xf32, #tpu.memory_space<vmem>>, %arg5: memref<128x128xf32, #tpu.memory_space<vmem>>) attributes {dimension_semantics = [#tpu.dimension_semantics<parallel>], iteration_bounds = array<i64: 1>, scalar_prefetch = 0 : i64, scratch_operands = 0 : i64, tpu.core_type = #tpu.core_type<tc>, window_params = [{transform_indices = @transform_0, window_bounds = array<i64: 128, 16>}, {pipeline_mode = #tpu.pipeline_mode<synchronous>, transform_indices = @transform_1, window_bounds = array<i64: 16, 128>}, {pipeline_mode = #tpu.pipeline_mode<synchronous>, transform_indices = @transform_2, window_bounds = array<i64: 1, 128>}, {transform_indices = @transform_3, window_bounds = array<i64: 128, 128>}, {transform_indices = @transform_4, window_bounds = array<i64: 128, 128>}]} {
    %c0 = arith.constant 0 : index
    %c0_0 = arith.constant 0 : index
    %0 = vector.load %arg1[%c0, %c0_0] : memref<128x16xf32, #tpu.memory_space<vmem>>, vector<128x16xf32>
    %c0_1 = arith.constant 0 : index
    %c0_2 = arith.constant 0 : index
    %1 = vector.load %arg2[%c0_1, %c0_2] : memref<16x128xf32, #tpu.memory_space<vmem>>, vector<16x128xf32>
    %c0_3 = arith.constant 0 : index
    %c0_4 = arith.constant 0 : index
    %2 = vector.load %arg3[%c0_3, %c0_4] : memref<1x128xf32, #tpu.memory_space<vmem>>, vector<1x128xf32>
    %cst = arith.constant dense<0.000000e+00> : vector<128x128xf32>
    %3 = tpu.matmul %0, %1, %cst {dimension_numbers = #tpu.dot_dimension_numbers<[1], [0], [0], [1], [0, 0, 1, 1], [], []>} : vector<128x16xf32>, vector<16x128xf32>, vector<128x128xf32> -> vector<128x128xf32>
    %4 = vector.broadcast %2 : vector<1x128xf32> to vector<128x128xf32>
    %5 = arith.addf %3, %4 : vector<128x128xf32>
    %6 = tpu.iota {dimensions = array<i32: 0>} : vector<128x128xi32>
    %c128_i32 = arith.constant 128 : i32
    %7 = arith.muli %arg0, %c128_i32 : i32
    %8 = vector.broadcast %7 : i32 to vector<128x128xi32>
    %9 = arith.addi %6, %8 : vector<128x128xi32>
    %c0_i32 = arith.constant 0 : i32
    %10 = vector.broadcast %c0_i32 : i32 to vector<128x128xi32>
    %11 = arith.cmpi eq, %9, %10 : vector<128x128xi32>
    %cst_5 = arith.constant -9.000000e+15 : f32
    %12 = vector.broadcast %cst_5 : f32 to vector<128x128xf32>
    %13 = arith.select %11, %12, %5 : vector<128x128xi1>, vector<128x128xf32>
    %c0_6 = arith.constant 0 : index
    %c0_7 = arith.constant 0 : index
    %14 = vector.load %arg4[%c0_6, %c0_7] : memref<128x128xf32, #tpu.memory_space<vmem>>, vector<128x128xf32>
    tpu.vector_store %arg4[%c0_6, %c0_7], %13 {strides = array<i32>} : memref<128x128xf32, #tpu.memory_space<vmem>>, vector<128x128xf32>,
    %15 = tpu.transpose %13, [1, 0] : vector<128x128xf32> -> vector<128x128xf32>
    %c0_8 = arith.constant 0 : index
    %c0_9 = arith.constant 0 : index
    %16 = vector.load %arg5[%c0_8, %c0_9] : memref<128x128xf32, #tpu.memory_space<vmem>>, vector<128x128xf32>
    tpu.vector_store %arg5[%c0_8, %c0_9], %15 {strides = array<i32>} : memref<128x128xf32, #tpu.memory_space<vmem>>, vector<128x128xf32>,
    return
  }
  func.func @transform_0(%arg0: i32) -> (i32, i32) {
    %c0_i32 = arith.constant 0 : i32
    %c0_i32_0 = arith.constant 0 : i32
    return %arg0, %c0_i32 : i32, i32
  }
  func.func @transform_1(%arg0: i32) -> (i32, i32) {
    %c0_i32 = arith.constant 0 : i32
    %c0_i32_0 = arith.constant 0 : i32
    %c0_i32_1 = arith.constant 0 : i32
    return %c0_i32, %c0_i32_0 : i32, i32
  }
  func.func @transform_2(%arg0: i32) -> (i32, i32) {
    %c0_i32 = arith.constant 0 : i32
    %c0_i32_0 = arith.constant 0 : i32
    %c0_i32_1 = arith.constant 0 : i32
    return %c0_i32, %c0_i32_0 : i32, i32
  }
  func.func @transform_3(%arg0: i32) -> (i32, i32) {
    %c0_i32 = arith.constant 0 : i32
    %c0_i32_0 = arith.constant 0 : i32
    return %arg0, %c0_i32 : i32, i32
  }
  func.func @transform_4(%arg0: i32) -> (i32, i32) {
    %c0_i32 = arith.constant 0 : i32
    %c0_i32_0 = arith.constant 0 : i32
    return %c0_i32, %arg0 : i32, i32
  }
}

</mosaic_0001>

<bundles_post_ra>
// kernel: tpu_custom_call.1
= control target key start
LH: loop header
LB: loop body
LE: loop exit
PB: predicated region body
PF: predicated region fallthrough
CT: control target
= control target key end

     0   :  { %10 = vsyncpa [#allocation3], 0  ;;  %vm43_vm0 = vcmask 130048   ;;  %s629_s0 = inlined_call_operand.vmem [shape: f32[128,16], index: 0, kind: input, shape index: {}]   ;;  %s630_s1 = inlined_call_operand.vmem [shape: f32[16,128], index: 1, kind: input, shape index: {}]   ;;  %s631_s2 = inlined_call_operand.vmem [shape: f32[1,128], index: 2, kind: input, shape index: {}]   ;;  %s632_s3 = inlined_call_operand.hbm [shape: f32[128,128], index: 3, kind: output, shape index: {0}]   ;;  %s633_s4 = inlined_call_operand.hbm [shape: f32[128,128], index: 4, kind: output, shape index: {1}]  }
   0x1   :  { %v35_v0 = vld [vmem:[%s630_s1 + $0x8] sm:$0xff]  ;;  %v34_v1 = vld [vmem:[%s630_s1] sm:$0xff]  ;;  %v20_v4 = vld [vmem:[%s629_s0 + $0x10] sm:$0xff] }
   0x2   :  { %v18_v2 = vld [vmem:[%s629_s0] sm:$0xff]  ;;  %435 = vmatprep.subr.mxu0 %v35_v0  ;;  %v19_v3 = vld [vmem:[%s629_s0 + $0x8] sm:$0xff]  ;;  %463 = vmatprep.subr.mxu1 %v35_v0  ;;  %v28_v7 = vld [vmem:[%s629_s0 + $0x50] sm:$0xff] }
   0x3   :  { %439 = vmatprep.mubr.msk.f32.mxu0 %vm43_vm0, %v18_v2  ;;  %436 = vmatpush3.msra.mxu0 %v35_v0  ;;  %v26_v5 = vld [vmem:[%s629_s0 + $0x40] sm:$0xff]  ;;  %v27_v6 = vld [vmem:[%s629_s0 + $0x48] sm:$0xff]  ;;  %v21_v8 = vld [vmem:[%s629_s0 + $0x18] sm:$0xff] }
   0x4   :  { %437 = vmatprep.subr.mxu0 %v34_v1  ;;  %465 = vmatpush3.msra.mxu1 %v35_v0 }
   0x5   :  { %438 = vmatpush3.msra.mxu0 %v34_v1  ;;  %464 = vmatprep.subr.mxu1 %v34_v1 }
   0x6   :  { %440 = vmatmul.mubr.msk.f32.vlgmr.msra.gmra.mxu0 %vm43_vm0, %v19_v3  ;;  %466 = vmatpush3.msra.mxu1 %v34_v1 }
   0x7   :  { %442 = vmatprep.mubr.msk.f32.mxu0 %vm43_vm0, %v20_v4  ;;  %451 = vmatprep.mubr.msk.f32.mxu1 %vm43_vm0, %v26_v5 }
   0x8   :  { %11 = vsyncpa [#allocation5], 0  ;;  %v22_v9 = vld [vmem:[%s629_s0 + $0x20] sm:$0xff]  ;;  %452 = vmatmul.mubr.msk.f32.vlgmr.msra.gmra.mxu1 %vm43_vm0, %v27_v6  ;;  %v29_v10 = vld [vmem:[%s629_s0 + $0x58] sm:$0xff]  ;;  %v237_v18 = vlaneseq }
   0x9   :  { %454 = vmatprep.mubr.msk.f32.mxu1 %vm43_vm0, %v28_v7  ;;  %v30_v11 = vld [vmem:[%s629_s0 + $0x60] sm:$0xff]  ;;  %v23_v12 = vld [vmem:[%s629_s0 + $0x28] sm:$0xff]  ;;  %v24_v13 = vld [vmem:[%s629_s0 + $0x30] sm:$0xff] }
   0xa   :  { %443 = vmatmul.mubr.msk.f32.gmra.mxu0 %vm43_vm0, %v21_v8  ;;  %v31_v14 = vld [vmem:[%s629_s0 + $0x68] sm:$0xff]  ;;  %v32_v15 = vld [vmem:[%s629_s0 + $0x70] sm:$0xff]  ;;  %v25_v16 = vld [vmem:[%s629_s0 + $0x38] sm:$0xff]  ;;  %v238_v20 = vshrl.u32 %v237_v18, 7 }
   0xb   :  { %445 = vmatprep.mubr.msk.f32.mxu0 %vm43_vm0, %v22_v9  ;;  %v33_v17 = vld [vmem:[%s629_s0 + $0x78] sm:$0xff]  ;;  %v400_v19 = vld [vmem:[%s631_s2] ss:$0 sm:$0xff]  ;;  %s515_s0 = smov [#allocation2]  }
   0xc   :  { %455 = vmatmul.mubr.msk.f32.gmra.mxu1 %vm43_vm0, %v29_v10  ;;  %vm272_vm1 = vcmp.eq.s32.totalorder %v238_v20, 0  ;;  %s373_s2 = sshll.u32 %s515_s0, 4  ;;  %s374_s2 = int_to_ptr.vmem [resolvable:$true] %s373_s2 }
   0xd   :  { %457 = vmatprep.mubr.msk.f32.mxu1 %vm43_vm0, %v30_v11  ;;  %s471_s25 = scalar_lea.vmem %s374_s2, 2048  ;;  %p476_p1 = scmp.lt.s32.totalorder %s374_s2, %s374_s2 }
   0xe   :  { %446 = vmatmul.mubr.msk.f32.gmra.mxu0 %vm43_vm0, %v23_v12  ;;  %p472_p0 = scmp.ne.s32.totalorder %s374_s2, %s471_s25  ;;  %p477_p2 = scmp.lt.s32.totalorder %s471_s25, %s471_s25 }
   0xf   :  { %448 = vmatprep.mubr.msk.f32.mxu0 %vm43_vm0, %v24_v13 }
  0x10   :  { %458 = vmatmul.mubr.msk.f32.gmra.mxu1 %vm43_vm0, %v31_v14  ;;  %p478_p3 = por %p477_p2, %p476_p1 }
  0x11   :  { %460 = vmatprep.mubr.msk.f32.mxu1 %vm43_vm0, %v32_v15 }
  0x12   :  { %449 = vmatmul.mubr.msk.f32.gmra.mxu0 %vm43_vm0, %v25_v16  ;;  %p479_p4 = pnand %p478_p3, %p472_p0 }
  0x14   :  { %461 = vmatmul.mubr.msk.f32.gmra.mxu1 %vm43_vm0, %v33_v17 }
  0xc6   :  { %v441_v21 = vpop.f32.mrf.mxu0 }
  0xc7   :  { %v164_v22 = vadd.f32 %v441_v21, %v400_v19 }
  0xc8   :  { %v158_v23 = vpop.f32.mrf.mxu0  ;;  %v453_v24 = vpop.f32.mrf.mxu1 }
  0xc9   :  { %305 = vst [vmem:[#allocation2 + $0x8] sm:$0xff] %v164_v22  ;;  %v159_v25 = vadd.f32 %v400_v19, %v158_v23  ;;  %v204_v26 = vadd.f32 %v453_v24, %v400_v19 }
  0xca   :  { %v444_v27 = vpop.f32.mrf.mxu0  ;;  %v198_v28 = vpop.f32.mrf.mxu1 }
  0xcb   :  { %v288_v29 = vsel %vm272_vm1, -9e+15, %v159_v25  ;;  %v174_v30 = vadd.f32 %v444_v27, %v400_v19  ;;  %313 = vst [vmem:[#allocation2 + $0x48] sm:$0xff] %v204_v26  ;;  %v199_v31 = vadd.f32 %v400_v19, %v198_v28 }
  0xcc   :  { %304 = vst [vmem:[#allocation2] sm:$0xff] %v288_v29  ;;  %320 = vxpose.xlu0.b32.start [1/16] %v288_v29, 128  ;;  %v168_v32 = vpop.f32.mrf.mxu0  ;;  %v456_v33 = vpop.f32.mrf.mxu1 }
  0xcd   :  { %307 = vst [vmem:[#allocation2 + $0x18] sm:$0xff] %v174_v30  ;;  %v169_v34 = vadd.f32 %v400_v19, %v168_v32  ;;  %312 = vst [vmem:[#allocation2 + $0x40] sm:$0xff] %v199_v31  ;;  %v214_v35 = vadd.f32 %v456_v33, %v400_v19 }
  0xce   :  { %v447_v36 = vpop.f32.mrf.mxu0  ;;  %v208_v37 = vpop.f32.mrf.mxu1 }
  0xcf   :  { %306 = vst [vmem:[#allocation2 + $0x10] sm:$0xff] %v169_v34  ;;  %v184_v38 = vadd.f32 %v447_v36, %v400_v19  ;;  %315 = vst [vmem:[#allocation2 + $0x58] sm:$0xff] %v214_v35  ;;  %v209_v39 = vadd.f32 %v400_v19, %v208_v37 }
  0xd0   :  { %321 = vxpose.xlu0.b32.cont [2/16] %v164_v22, 128  ;;  %v178_v40 = vpop.f32.mrf.mxu0  ;;  %v459_v41 = vpop.f32.mrf.mxu1 }
  0xd1   :  { %309 = vst [vmem:[#allocation2 + $0x28] sm:$0xff] %v184_v38  ;;  %v179_v42 = vadd.f32 %v400_v19, %v178_v40  ;;  %314 = vst [vmem:[#allocation2 + $0x50] sm:$0xff] %v209_v39  ;;  %v224_v43 = vadd.f32 %v459_v41, %v400_v19 }
  0xd2   :  { %v450_v44 = vpop.f32.mrf.mxu0  ;;  %v218_v45 = vpop.f32.mrf.mxu1 }
  0xd3   :  { %308 = vst [vmem:[#allocation2 + $0x20] sm:$0xff] %v179_v42  ;;  %v194_v46 = vadd.f32 %v450_v44, %v400_v19  ;;  %317 = vst [vmem:[#allocation2 + $0x68] sm:$0xff] %v224_v43  ;;  %v219_v47 = vadd.f32 %v400_v19, %v218_v45 }
  0xd4   :  { %322 = vxpose.xlu0.b32.cont [3/16] %v169_v34, 128  ;;  %v188_v48 = vpop.f32.mrf.mxu0  ;;  %v462_v49 = vpop.f32.mrf.mxu1 }
  0xd5   :  { %311 = vst [vmem:[#allocation2 + $0x38] sm:$0xff] %v194_v46  ;;  %v189_v50 = vadd.f32 %v400_v19, %v188_v48  ;;  %316 = vst [vmem:[#allocation2 + $0x60] sm:$0xff] %v219_v47  ;;  %v234_v51 = vadd.f32 %v462_v49, %v400_v19 }
  0xd6   :  { %v228_v52 = vpop.f32.mrf.mxu1 }
  0xd7   :  { %310 = vst [vmem:[#allocation2 + $0x30] sm:$0xff] %v189_v50  ;;  %319 = vst [vmem:[#allocation2 + $0x78] sm:$0xff] %v234_v51  ;;  %v229_v53 = vadd.f32 %v400_v19, %v228_v52 }
  0xd8   :  { %323 = vxpose.xlu0.b32.cont [4/16] %v174_v30, 128 }
  0xd9   :  { %318 = vst [vmem:[#allocation2 + $0x70] sm:$0xff] %v229_v53 }
  0xdc   :  { %324 = vxpose.xlu0.b32.cont [5/16] %v179_v42, 128 }
  0xe0   :  { %325 = vxpose.xlu0.b32.cont [6/16] %v184_v38, 128 }
  0xe4   :  { %326 = vxpose.xlu0.b32.cont [7/16] %v189_v50, 128 }
  0xe8   :  { %327 = vxpose.xlu0.b32.cont [8/16] %v194_v46, 128 }
  0xec   :  { %328 = vxpose.xlu0.b32.cont [9/16] %v199_v31, 128 }
  0xf0   :  { %329 = vxpose.xlu0.b32.cont [10/16] %v204_v26, 128 }
  0xf4   :  { %330 = vxpose.xlu0.b32.cont [11/16] %v209_v39, 128 }
  0xf8   :  { %331 = vxpose.xlu0.b32.cont [12/16] %v214_v35, 128 }
  0xfc   :  { %332 = vxpose.xlu0.b32.cont [13/16] %v219_v47, 128 }
 0x100   :  { %333 = vxpose.xlu0.b32.cont [14/16] %v224_v43, 128 }
 0x104   :  { %334 = vxpose.xlu0.b32.cont [15/16] %v229_v53, 128 }
 0x105   :  { %482 = shalt.err (!%p479_p4)
}
 0x106   :  { %s516_s26 = smov 128   ;;  %s517_s27 = smov 8  }
 0x107   :  { %379 = dma.vmem_to_hbm [thread:$0]  %s374_s2, 2048, %s632_s3, [#allocation3], %s516_s26, %s516_s26, %s517_s27  }
 0x108   :  { %335 = vxpose.xlu0.b32.end [16/16] %v234_v51, 128  ;;  %s518_s3 = smov [#allocation4]  }
 0x109   :  { %s385_s30 = sshll.u32 %s518_s3, 4  ;;  %s386_s30 = int_to_ptr.vmem [resolvable:$true] %s385_s30 }
 0x10a   :  { %s491_s5 = scalar_lea.vmem %s386_s30, 2048  ;;  %p496_p6 = scmp.lt.s32.totalorder %s386_s30, %s386_s30 }
 0x10b   :  { %p492_p5 = scmp.ne.s32.totalorder %s386_s30, %s491_s5  ;;  %p497_p7 = scmp.lt.s32.totalorder %s491_s5, %s491_s5 }
 0x10d   :  { %p498_p8 = por %p497_p7, %p496_p6 }
 0x10f   :  { %p499_p9 = pnand %p498_p8, %p492_p5 }
 0x148   :  { %v336_v54 = vpop.trf.xlu0 }
 0x149   :  { %352 = vst [vmem:[#allocation4] sm:$0xff] %v336_v54 }
 0x14c   :  { %v337_v55 = vpop.trf.xlu0 }
 0x14d   :  { %353 = vst [vmem:[#allocation4 + $0x8] sm:$0xff] %v337_v55 }
 0x150   :  { %v338_v56 = vpop.trf.xlu0 }
 0x151   :  { %354 = vst [vmem:[#allocation4 + $0x10] sm:$0xff] %v338_v56 }
 0x154   :  { %v339_v57 = vpop.trf.xlu0 }
 0x155   :  { %355 = vst [vmem:[#allocation4 + $0x18] sm:$0xff] %v339_v57 }
 0x158   :  { %v340_v58 = vpop.trf.xlu0 }
 0x159   :  { %356 = vst [vmem:[#allocation4 + $0x20] sm:$0xff] %v340_v58 }
 0x15c   :  { %v341_v59 = vpop.trf.xlu0 }
 0x15d   :  { %357 = vst [vmem:[#allocation4 + $0x28] sm:$0xff] %v341_v59 }
 0x160   :  { %v342_v60 = vpop.trf.xlu0 }
 0x161   :  { %358 = vst [vmem:[#allocation4 + $0x30] sm:$0xff] %v342_v60 }
 0x164   :  { %v343_v61 = vpop.trf.xlu0 }
 0x165   :  { %359 = vst [vmem:[#allocation4 + $0x38] sm:$0xff] %v343_v61 }
 0x168   :  { %v344_v62 = vpop.trf.xlu0 }
 0x169   :  { %360 = vst [vmem:[#allocation4 + $0x40] sm:$0xff] %v344_v62 }
 0x16c   :  { %v345_v63 = vpop.trf.xlu0 }
 0x16d   :  { %361 = vst [vmem:[#allocation4 + $0x48] sm:$0xff] %v345_v63 }
 0x170   :  { %v346_v0 = vpop.trf.xlu0 }
 0x171   :  { %362 = vst [vmem:[#allocation4 + $0x50] sm:$0xff] %v346_v0 }
 0x174   :  { %v347_v1 = vpop.trf.xlu0 }
 0x175   :  { %363 = vst [vmem:[#allocation4 + $0x58] sm:$0xff] %v347_v1 }
 0x178   :  { %v348_v2 = vpop.trf.xlu0 }
 0x179   :  { %364 = vst [vmem:[#allocation4 + $0x60] sm:$0xff] %v348_v2 }
 0x17c   :  { %v349_v3 = vpop.trf.xlu0 }
 0x17d   :  { %365 = vst [vmem:[#allocation4 + $0x68] sm:$0xff] %v349_v3 }
 0x180   :  { %v350_v4 = vpop.trf.xlu0 }
 0x181   :  { %366 = vst [vmem:[#allocation4 + $0x70] sm:$0xff] %v350_v4 }
 0x184   :  { %v351_v5 = vpop.trf.xlu0 }
 0x185   :  { %367 = vst [vmem:[#allocation4 + $0x78] sm:$0xff] %v351_v5 }
 0x186   :  { %502 = shalt.err (!%p499_p9)
}
 0x187   :  { %391 = dma.vmem_to_hbm [thread:$0]  %s386_s30, 2048, %s633_s4, [#allocation5], %s516_s26, %s516_s26, %s517_s27  }
 0x188   :  { %511 = dma.done.wait [#allocation3], 2048  }
 0x189   :  { %512 = vsyncadd [#allocation3], 4294965248 }
 0x18a   :  { %513 = dma.done.wait [#allocation5], 2048  }
 0x18b   :  { %514 = vsyncadd [#allocation5], 4294965248 }
 0x18c   :  { %398 = vsyncpa [#allocation3], 1 }
 0x18d   :  { %399 = vsyncpa [#allocation5], 1 }

</bundles_post_ra>
